<compile_context>
chip_gen: v7x
topology: tpu7x:2x2x1
jax: 0.10.0
libtpu: 0.0.40
codegen_flags: <defaults>
</compile_context>

<pallas_src>
import functools
import math

import jax
import jax.numpy as jnp
import numpy as np
from jax.experimental import pallas as pl
from jax.experimental.pallas import tpu as pltpu


# ----------------------------------------------------------------------------
# In-kernel helpers (pure jnp/lax, traced inside the Pallas kernels)
# ----------------------------------------------------------------------------
_NT_DIMS = (((1,), (1,)), ((), ()))          # contract last dims: A @ B^T


def _layernorm(x, gamma, beta, eps=1e-12):
    mean = jnp.mean(x, axis=-1, keepdims=True)
    cent = x - mean
    var = jnp.mean(cent * cent, axis=-1, keepdims=True)
    return cent * jax.lax.rsqrt(var + eps) * gamma + beta


def _gelu_tanh(x):
    # TODO(synk): tanh-approx GELU; swap for erf if the real output block uses
    # torch.nn.GELU() (erf) — ~1e-3-level difference.
    c = 0.7978845608028654                   # sqrt(2/pi)
    return 0.5 * x * (1.0 + jnp.tanh(c * (x + 0.044715 * x * x * x)))


def _eye_f32(n):
    rows = jax.lax.broadcasted_iota(jnp.int32, (n, n), 0)
    cols = jax.lax.broadcasted_iota(jnp.int32, (n, n), 1)
    return (rows == cols).astype(jnp.float32)


def _mxu_transpose(x, eye):
    """x.T for a small 2-D f32 array, done on the MXU.

    (eye NT-matmul x)[a, b] = sum_k eye[a, k] * x[b, k] = x[b, a].
    `eye` must be (x.shape[1], x.shape[1]); identities are built once and
    shared between call sites (JAX does not CSE broadcast_in_dim).
    """
    return jax.lax.dot_general(eye, x, _NT_DIMS,
                               preferred_element_type=jnp.float32)


def _attend(q_full, k_full, v_full, wo, bo, gamma, beta, q_in, h):
    """Post-projection `Attention` body (eval mode, no mask / weights).

    q_full/k_full/v_full: (n*, h*d_att) already projected + biased
    wo: (h*d_att, d_q)    bo/gamma/beta: (1, d_q)    q_in: (nq, d_q)
    """
    d_att = q_full.shape[-1] // h            # static python int
    scale = 1.0 / math.sqrt(d_att)
    heads = []
    for hh in range(h):                      # static, fully unrolled
        lo = hh * d_att
        qh = q_full[:, lo:lo + d_att]
        kh = k_full[:, lo:lo + d_att]
        vh = v_full[:, lo:lo + d_att]
        s = jax.lax.dot_general(qh, kh, _NT_DIMS,
                                preferred_element_type=jnp.float32) * scale
        s = s - jnp.max(s, axis=-1, keepdims=True)
        p = jnp.exp(s)
        # Exact divide kept on purpose (EUP nowhere near saturated; preserves
        # 2e-4 agreement with the f32 reference on all generations).
        p = p / jnp.sum(p, axis=-1, keepdims=True)
        heads.append(jnp.dot(p, vh, preferred_element_type=jnp.float32))
    o_cat = jnp.concatenate(heads, axis=-1)  # (nq, h*d_att), lane-dense
    out = q_in + jnp.dot(o_cat, wo, preferred_element_type=jnp.float32) + bo
    return _layernorm(out, gamma, beta)


# ----------------------------------------------------------------------------
# Pallas kernels
# ----------------------------------------------------------------------------
def attention_kernel(q_ref, k_ref, v_ref, wq_ref, wk_ref, wv_ref, wo_ref,
                     bqkv_ref, res_ref, out_ref, *, h):
    """Standalone `Attention.forward` (spec parity), one kernel.

    Full-width projections (3 matmuls) + per-head lane-sliced attention +
    one full-depth output projection.
    """
    q_in = q_ref[...]
    bqkv = bqkv_ref[...]                     # (3, h*d_att) = [bq, bk, bv]
    res = res_ref[...]                       # (3, d_q)     = [bo, gamma, beta]
    f32 = jnp.float32
    q = jnp.dot(q_in, wq_ref[...], preferred_element_type=f32) + bqkv[0:1, :]
    k = jnp.dot(k_ref[...], wk_ref[...], preferred_element_type=f32) + bqkv[1:2, :]
    v = jnp.dot(v_ref[...], wv_ref[...], preferred_element_type=f32) + bqkv[2:3, :]
    out_ref[...] = _attend(q, k, v, wo_ref[...],
                           res[0:1, :], res[1:2, :], res[2:3, :], q_in, h)


def fused_layer_kernel(a_ref, b_ref,
                       wqa_ref, wqat_ref, wkb_ref, wkbt_ref, wvb_ref, wvbt_ref,
                       pbias_ref, wox_ref, woy_ref, resx_ref, resy_ref,
                       wu_ref, wd_ref, out_ref, *, h):
    """Whole ParamAttentionLayer forward (4 Attention blocks + output MLP).

    Paired 256-wide projections:
      wqa  = [wq_xx | wq_xy] vs a      wqat = [wq_yx | wq_yy] vs a^T
      wkb  = [wk_xx | wk_yx] vs b      wkbt = [wk_xy | wk_yy] vs b^T
      wvb  = [wv_xx | wv_yx] vs b      wvbt = [wv_xy | wv_yy] vs b^T
    pbias rows: [bq_a, bq_at, bk_b, bk_bt, bv_b, bv_bt, bu(pad)]
    resx: (3,3,a1) = [xx, xy, output-MLP] rows of [bo/bd, gamma, beta]
    resy: (2,3,a0) = [yx, yy]
    """
    a = a_ref[...]                            # (a0, a1)
    b = b_ref[...]                            # (b0, b1)
    n = wqa_ref.shape[-1] // 2                # h * d_att (static)
    f32 = jnp.float32

    # Deduplicated transpose identities (built once).
    eye_a1 = _eye_f32(a.shape[1])
    eye_b1 = _eye_f32(b.shape[1])
    eye_a0 = _eye_f32(a.shape[0])
    a_t = _mxu_transpose(a, eye_a1)           # (a1, a0)
    b_t = _mxu_transpose(b, eye_b1)           # (b1, b0)

    pb = pbias_ref[...]                       # (7, 2n)

    # 6 paired 256-wide projection matmuls (instead of 12 x 128-wide).
    q_a  = jnp.dot(a,   wqa_ref[...],  preferred_element_type=f32) + pb[0:1, :]
    q_at = jnp.dot(a_t, wqat_ref[...], preferred_element_type=f32) + pb[1:2, :]
    k_b  = jnp.dot(b,   wkb_ref[...],  preferred_element_type=f32) + pb[2:3, :]
    k_bt = jnp.dot(b_t, wkbt_ref[...], preferred_element_type=f32) + pb[3:4, :]
    v_b  = jnp.dot(b,   wvb_ref[...],  preferred_element_type=f32) + pb[4:5, :]
    v_bt = jnp.dot(b_t, wvbt_ref[...], preferred_element_type=f32) + pb[5:6, :]

    rx = resx_ref[...]                        # (3, 3, a1)
    ry = resy_ref[...]                        # (2, 3, a0)

    xx = _attend(q_a[:, :n],  k_b[:, :n],  v_b[:, :n],  wox_ref[0],
                 rx[0, 0:1, :], rx[0, 1:2, :], rx[0, 2:3, :], a, h)   # (a0, a1)
    xy = _attend(q_a[:, n:],  k_bt[:, :n], v_bt[:, :n], wox_ref[1],
                 rx[1, 0:1, :], rx[1, 1:2, :], rx[1, 2:3, :], a, h)   # (a0, a1)
    yx = _attend(q_at[:, :n], k_b[:, n:],  v_b[:, n:],  woy_ref[0],
                 ry[0, 0:1, :], ry[0, 1:2, :], ry[0, 2:3, :], a_t, h) # (a1, a0)
    yy = _attend(q_at[:, n:], k_bt[:, n:], v_bt[:, n:], woy_ref[1],
                 ry[1, 0:1, :], ry[1, 1:2, :], ry[1, 2:3, :], a_t, h) # (a1, a0)

    # yx.T + yy.T == (yx + yy).T  -> one transpose instead of two.
    x = (xx + xy + _mxu_transpose(yx + yy, eye_a0)) * 0.25            # (a0, a1)

    # Output MLP block.
    up = jnp.dot(x, wu_ref[...], preferred_element_type=f32) \
        + pb[6:7, :wu_ref.shape[1]]
    up = _gelu_tanh(up)
    down = jnp.dot(up, wd_ref[...], preferred_element_type=f32) + rx[2, 0:1, :]
    # TODO(synk): output-block LayerNorm eps kept at 1e-12 (torch default 1e-5).
    out_ref[...] = _layernorm(down + x, rx[2, 1:2, :], rx[2, 2:3, :])


# ----------------------------------------------------------------------------
# Wrappers (pallas_call glue + trace-time parameter packing)
# ----------------------------------------------------------------------------
def _vmem_specs(n):
    return [pl.BlockSpec(memory_space=pltpu.MemorySpace.VMEM)] * n


def attention_forward(queries, keys, values, p, h):
    """Single `Attention` module forward as one Pallas kernel (9 operands)."""
    bqkv = jnp.concatenate([p["bq"], p["bk"], p["bv"]], axis=0)       # (3, h*d_att)
    res = jnp.concatenate([p["bo"], p["gamma"], p["beta"]], axis=0)   # (3, d_q)
    args = [queries, keys, values, p["wq"], p["wk"], p["wv"], p["wo"], bqkv, res]
    return pl.pallas_call(
        functools.partial(attention_kernel, h=h),
        out_shape=jax.ShapeDtypeStruct(queries.shape, jnp.float32),
        in_specs=_vmem_specs(len(args)),
        out_specs=pl.BlockSpec(memory_space=pltpu.MemorySpace.VMEM),
    )(*args)


def _pack_fused_layer_args(param_a, param_b, params):
    """Trace-time packing: paired 256-wide weights + few fat bias operands.

    (Tiny one-time packs; in production they would be precomputed once, here
    they are traced into the jitted layer function which is fine at this size.)
    """
    pxx, pxy, pyx, pyy = params["xx"], params["xy"], params["yx"], params["yy"]
    po = params["output"]
    n = pxx["wq"].shape[1]
    for p in (pxy, pyx, pyy):
        assert p["wq"].shape[1] == n, "block pairing needs equal h*d_att widths"
    assert po["bu"].shape[1] <= 2 * n

    cat1 = lambda x, y: jnp.concatenate([x, y], axis=1)
    wqa, wqat = cat1(pxx["wq"], pxy["wq"]), cat1(pyx["wq"], pyy["wq"])
    wkb, wkbt = cat1(pxx["wk"], pyx["wk"]), cat1(pxy["wk"], pyy["wk"])
    wvb, wvbt = cat1(pxx["wv"], pyx["wv"]), cat1(pxy["wv"], pyy["wv"])
    pbias = jnp.concatenate([
        cat1(pxx["bq"], pxy["bq"]), cat1(pyx["bq"], pyy["bq"]),
        cat1(pxx["bk"], pyx["bk"]), cat1(pxy["bk"], pyy["bk"]),
        cat1(pxx["bv"], pyx["bv"]), cat1(pxy["bv"], pyy["bv"]),
        jnp.pad(po["bu"], ((0, 0), (0, 2 * n - po["bu"].shape[1]))),
    ], axis=0)                                                   # (7, 2n)
    wox = jnp.stack([pxx["wo"], pxy["wo"]], axis=0)              # (2, n, a1)
    woy = jnp.stack([pyx["wo"], pyy["wo"]], axis=0)              # (2, n, a0)
    res3 = lambda p: jnp.concatenate([p["bo"], p["gamma"], p["beta"]], axis=0)
    resx = jnp.stack(
        [res3(pxx), res3(pxy),
         jnp.concatenate([po["bd"], po["gamma"], po["beta"]], axis=0)],
        axis=0)                                                  # (3, 3, a1)
    resy = jnp.stack([res3(pyx), res3(pyy)], axis=0)             # (2, 3, a0)
    return [param_a, param_b, wqa, wqat, wkb, wkbt, wvb, wvbt,
            pbias, wox, woy, resx, resy, po["wu"], po["wd"]]


def param_attention_layer(param_a, param_b, params, h):
    """Whole-layer forward: ONE grid-less pallas_call, 15 operands in VMEM."""
    # TODO(synk): on v7x the {xx,xy} vs {yx,yy} blocks could be split across
    # the two TensorCores; only worthwhile if compute (not launch/DMA latency)
    # dominates, so kept single-core here.
    args = _pack_fused_layer_args(param_a, param_b, params)
    return pl.pallas_call(
        functools.partial(fused_layer_kernel, h=h),
        out_shape=jax.ShapeDtypeStruct(param_a.shape, jnp.float32),
        in_specs=_vmem_specs(len(args)),
        out_specs=pl.BlockSpec(memory_space=pltpu.MemorySpace.VMEM),
    )(*args)


# ----------------------------------------------------------------------------
# Deterministic parameter construction (arrays only -- no ints in the pytree)
# ----------------------------------------------------------------------------
def _linear(key, d_in, d_out):
    k1, k2 = jax.random.split(key)
    w = jax.random.normal(k1, (d_in, d_out), jnp.float32) / np.sqrt(d_in)
    b = jax.random.normal(k2, (1, d_out), jnp.float32) * 0.02
    return w, b


def make_attention_params(key, d_q, d_k, d_v, d_att, h):
    ks = jax.random.split(key, 4)
    wq, bq = _linear(ks[0], d_q, h * d_att)
    wk, bk = _linear(ks[1], d_k, h * d_att)
    wv, bv = _linear(ks[2], d_v, h * d_att)
    wo, bo = _linear(ks[3], h * d_att, d_q)
    return dict(wq=wq, bq=bq, wk=wk, bk=bk, wv=wv, bv=bv, wo=wo, bo=bo,
                gamma=jnp.ones((1, d_q), jnp.float32),
                beta=jnp.zeros((1, d_q), jnp.float32))


def _spectral_normalize(w):
    # TODO(synk): torch's spectral_norm uses one power-iteration step with a
    # persistent u vector; the exact largest singular value is used here.
    sigma = np.linalg.norm(np.asarray(w), ord=2)
    return w / jnp.float32(sigma)


def make_output_params(key, dim):
    k1, k2 = jax.random.split(key)
    wu, bu = _linear(k1, dim, 2 * dim)
    wd, bd = _linear(k2, 2 * dim, dim)
    return dict(wu=_spectral_normalize(wu), bu=bu,
                wd=_spectral_normalize(wd), bd=bd,
                gamma=jnp.ones((1, dim), jnp.float32),
                beta=jnp.zeros((1, dim), jnp.float32))


def make_param_attention_layer(key, a_size, b_size, h):
    a0, a1 = a_size
    b0, b1 = b_size

    def d_att(d1, d2):
        width = max((d1 + d2) // 2, 128)
        assert width % h == 0, "h must divide the attention width"
        return width // h

    ks = jax.random.split(key, 5)
    return dict(
        xx=make_attention_params(ks[0], a1, b1, b1, d_att(a1, b1), h),
        xy=make_attention_params(ks[1], a1, b0, b0, d_att(a1, b0), h),
        yx=make_attention_params(ks[2], a0, b1, b1, d_att(a0, b1), h),
        yy=make_attention_params(ks[3], a0, b0, b0, d_att(a0, b0), h),
        output=make_output_params(ks[4], a1),
    )


# ----------------------------------------------------------------------------
# Pure-JAX reference (correctness check only)
# ----------------------------------------------------------------------------
def _ref_layernorm(x, g, b, eps=1e-12):
    m = jnp.mean(x, -1, keepdims=True)
    v = jnp.mean((x - m) ** 2, -1, keepdims=True)
    return (x - m) / jnp.sqrt(v + eps) * g + b


def _ref_attention(q_in, k_in, v_in, p, h):
    nq, nk = q_in.shape[0], k_in.shape[0]
    d = p["wq"].shape[1] // h
    q = (q_in @ p["wq"] + p["bq"]).reshape(nq, h, d).transpose(1, 0, 2)
    k = (k_in @ p["wk"] + p["bk"]).reshape(nk, h, d).transpose(1, 2, 0)
    v = (v_in @ p["wv"] + p["bv"]).reshape(nk, h, d).transpose(1, 0, 2)
    att = jax.nn.softmax(jnp.matmul(q, k) / np.sqrt(d), axis=-1)
    out = jnp.matmul(att, v).transpose(1, 0, 2).reshape(nq, h * d)
    return _ref_layernorm(q_in + out @ p["wo"] + p["bo"], p["gamma"], p["beta"])


def _ref_layer(a, b, P, h):
    xx = _ref_attention(a, b, b, P["xx"], h)
    xy = _ref_attention(a, b.T, b.T, P["xy"], h)
    yx = _ref_attention(a.T, b, b, P["yx"], h)
    yy = _ref_attention(a.T, b.T, b.T, P["yy"], h)
    x = (xx + xy + yx.T + yy.T) / 4
    po = P["output"]
    up = _gelu_tanh(x @ po["wu"] + po["bu"])
    down = up @ po["wd"] + po["bd"]
    return _ref_layernorm(down + x, po["gamma"], po["beta"])


# ----------------------------------------------------------------------------
if __name__ == "__main__":
    a_size = (16, 32)    # param_a: (A0, A1)
    b_size = (24, 40)    # param_b: (B0, B1)
    h = 4

    root = jax.random.PRNGKey(0)
    k_params, k_a, k_b = jax.random.split(root, 3)

    params = make_param_attention_layer(k_params, a_size, b_size, h)
    param_a = jax.random.normal(k_a, a_size, jnp.float32)
    param_b = jax.random.normal(k_b, b_size, jnp.float32)

    # 1) Single Attention module (the spec'd class) as one Pallas kernel.
    att_fn = jax.jit(attention_forward, static_argnames=("h",))
    att_out = jax.block_until_ready(att_fn(param_a, param_b, param_b,
                                           params["xx"], h=h))
    att_ref = _ref_attention(param_a, param_b, param_b, params["xx"], h)
    np.testing.assert_allclose(np.asarray(att_out), np.asarray(att_ref),
                               rtol=2e-4, atol=2e-4)

    # 2) Full layer forward fused into a single Pallas kernel.
    layer_fn = jax.jit(param_attention_layer, static_argnames=("h",))
    out = jax.block_until_ready(layer_fn(param_a, param_b, params, h=h))
    ref = _ref_layer(param_a, param_b, params, h)
    np.testing.assert_allclose(np.asarray(out), np.asarray(ref),
                               rtol=2e-4, atol=2e-4)
    assert out.shape == a_size

    print("KERNEL_OK")
</pallas_src>

<mosaic_0001>
module attributes {stable_mosaic.version = 11 : i64} {
  func.func @attention_kernel(%arg0: memref<16x32xf32, #tpu.memory_space<vmem>>, %arg1: memref<24x40xf32, #tpu.memory_space<vmem>>, %arg2: memref<24x40xf32, #tpu.memory_space<vmem>>, %arg3: memref<32x128xf32, #tpu.memory_space<vmem>>, %arg4: memref<40x128xf32, #tpu.memory_space<vmem>>, %arg5: memref<40x128xf32, #tpu.memory_space<vmem>>, %arg6: memref<128x32xf32, #tpu.memory_space<vmem>>, %arg7: memref<3x128xf32, #tpu.memory_space<vmem>>, %arg8: memref<3x32xf32, #tpu.memory_space<vmem>>, %arg9: memref<16x32xf32, #tpu.memory_space<vmem>>) attributes {dimension_semantics = [], scalar_prefetch = 0 : i64, scratch_operands = 0 : i64, tpu.core_type = #tpu.core_type<tc>} {
    %c0 = arith.constant 0 : index
    %c0_0 = arith.constant 0 : index
    %0 = vector.load %arg0[%c0, %c0_0] : memref<16x32xf32, #tpu.memory_space<vmem>>, vector<16x32xf32>
    %c0_1 = arith.constant 0 : index
    %c0_2 = arith.constant 0 : index
    %1 = vector.load %arg7[%c0_1, %c0_2] : memref<3x128xf32, #tpu.memory_space<vmem>>, vector<3x128xf32>
    %c0_3 = arith.constant 0 : index
    %c0_4 = arith.constant 0 : index
    %2 = vector.load %arg8[%c0_3, %c0_4] : memref<3x32xf32, #tpu.memory_space<vmem>>, vector<3x32xf32>
    %c0_5 = arith.constant 0 : index
    %c0_6 = arith.constant 0 : index
    %3 = vector.load %arg3[%c0_5, %c0_6] : memref<32x128xf32, #tpu.memory_space<vmem>>, vector<32x128xf32>
    %cst = arith.constant dense<0.000000e+00> : vector<16x128xf32>
    %4 = tpu.matmul %0, %3, %cst {dimension_numbers = #tpu.dot_dimension_numbers<[1], [0], [0], [1], [0, 0, 1, 1], [], []>} : vector<16x32xf32>, vector<32x128xf32>, vector<16x128xf32> -> vector<16x128xf32>
    %5 = vector.extract_strided_slice %1 {offsets = [0, 0], sizes = [1, 128], strides = [1, 1]} : vector<3x128xf32> to vector<1x128xf32>
    %6 = vector.broadcast %5 : vector<1x128xf32> to vector<16x128xf32>
    %7 = arith.addf %4, %6 : vector<16x128xf32>
    %c0_7 = arith.constant 0 : index
    %c0_8 = arith.constant 0 : index
    %8 = vector.load %arg1[%c0_7, %c0_8] : memref<24x40xf32, #tpu.memory_space<vmem>>, vector<24x40xf32>
    %c0_9 = arith.constant 0 : index
    %c0_10 = arith.constant 0 : index
    %9 = vector.load %arg4[%c0_9, %c0_10] : memref<40x128xf32, #tpu.memory_space<vmem>>, vector<40x128xf32>
    %cst_11 = arith.constant dense<0.000000e+00> : vector<24x128xf32>
    %10 = tpu.matmul %8, %9, %cst_11 {dimension_numbers = #tpu.dot_dimension_numbers<[1], [0], [0], [1], [0, 0, 1, 1], [], []>} : vector<24x40xf32>, vector<40x128xf32>, vector<24x128xf32> -> vector<24x128xf32>
    %11 = vector.extract_strided_slice %1 {offsets = [1, 0], sizes = [1, 128], strides = [1, 1]} : vector<3x128xf32> to vector<1x128xf32>
    %12 = vector.broadcast %11 : vector<1x128xf32> to vector<24x128xf32>
    %13 = arith.addf %10, %12 : vector<24x128xf32>
    %c0_12 = arith.constant 0 : index
    %c0_13 = arith.constant 0 : index
    %14 = vector.load %arg2[%c0_12, %c0_13] : memref<24x40xf32, #tpu.memory_space<vmem>>, vector<24x40xf32>
    %c0_14 = arith.constant 0 : index
    %c0_15 = arith.constant 0 : index
    %15 = vector.load %arg5[%c0_14, %c0_15] : memref<40x128xf32, #tpu.memory_space<vmem>>, vector<40x128xf32>
    %cst_16 = arith.constant dense<0.000000e+00> : vector<24x128xf32>
    %16 = tpu.matmul %14, %15, %cst_16 {dimension_numbers = #tpu.dot_dimension_numbers<[1], [0], [0], [1], [0, 0, 1, 1], [], []>} : vector<24x40xf32>, vector<40x128xf32>, vector<24x128xf32> -> vector<24x128xf32>
    %17 = vector.extract_strided_slice %1 {offsets = [2, 0], sizes = [1, 128], strides = [1, 1]} : vector<3x128xf32> to vector<1x128xf32>
    %18 = vector.broadcast %17 : vector<1x128xf32> to vector<24x128xf32>
    %19 = arith.addf %16, %18 : vector<24x128xf32>
    %c0_17 = arith.constant 0 : index
    %c0_18 = arith.constant 0 : index
    %20 = vector.load %arg6[%c0_17, %c0_18] : memref<128x32xf32, #tpu.memory_space<vmem>>, vector<128x32xf32>
    %21 = vector.extract_strided_slice %2 {offsets = [0, 0], sizes = [1, 32], strides = [1, 1]} : vector<3x32xf32> to vector<1x32xf32>
    %22 = vector.extract_strided_slice %2 {offsets = [1, 0], sizes = [1, 32], strides = [1, 1]} : vector<3x32xf32> to vector<1x32xf32>
    %23 = vector.extract_strided_slice %2 {offsets = [2, 0], sizes = [1, 32], strides = [1, 1]} : vector<3x32xf32> to vector<1x32xf32>
    %24 = vector.extract_strided_slice %7 {offsets = [0, 0], sizes = [16, 32], strides = [1, 1]} : vector<16x128xf32> to vector<16x32xf32>
    %25 = vector.extract_strided_slice %13 {offsets = [0, 0], sizes = [24, 32], strides = [1, 1]} : vector<24x128xf32> to vector<24x32xf32>
    %26 = vector.extract_strided_slice %19 {offsets = [0, 0], sizes = [24, 32], strides = [1, 1]} : vector<24x128xf32> to vector<24x32xf32>
    %cst_19 = arith.constant dense<0.000000e+00> : vector<16x24xf32>
    %27 = tpu.matmul %24, %25, %cst_19 {dimension_numbers = #tpu.dot_dimension_numbers<[1], [1], [0], [0], [0, 0, 1, 0], [], []>} : vector<16x32xf32>, vector<24x32xf32>, vector<16x24xf32> -> vector<16x24xf32>
    %cst_20 = arith.constant 0.176776692 : f32
    %28 = vector.broadcast %cst_20 : f32 to vector<16x24xf32>
    %29 = arith.mulf %27, %28 : vector<16x24xf32>
    %cst_21 = arith.constant dense<0xFF800000> : vector<16xf32>
    %30 = vector.multi_reduction <maximumf>, %29, %cst_21 [1] : vector<16x24xf32> to vector<16xf32>
    %31 = vector.shape_cast %30 : vector<16xf32> to vector<16x1xf32>
    %32 = vector.broadcast %31 : vector<16x1xf32> to vector<16x24xf32>
    %33 = arith.subf %29, %32 : vector<16x24xf32>
    %34 = math.exp %33 : vector<16x24xf32>
    %cst_22 = arith.constant dense<0.000000e+00> : vector<16xf32>
    %35 = vector.multi_reduction <add>, %34, %cst_22 [1] : vector<16x24xf32> to vector<16xf32>
    %36 = vector.shape_cast %35 : vector<16xf32> to vector<16x1xf32>
    %37 = vector.broadcast %36 : vector<16x1xf32> to vector<16x24xf32>
    %38 = arith.divf %34, %37 : vector<16x24xf32>
    %cst_23 = arith.constant dense<0.000000e+00> : vector<16x32xf32>
    %39 = tpu.matmul %38, %26, %cst_23 {dimension_numbers = #tpu.dot_dimension_numbers<[1], [0], [0], [1], [0, 0, 1, 1], [], []>} : vector<16x24xf32>, vector<24x32xf32>, vector<16x32xf32> -> vector<16x32xf32>
    %40 = vector.extract_strided_slice %7 {offsets = [0, 32], sizes = [16, 32], strides = [1, 1]} : vector<16x128xf32> to vector<16x32xf32>
    %41 = vector.extract_strided_slice %13 {offsets = [0, 32], sizes = [24, 32], strides = [1, 1]} : vector<24x128xf32> to vector<24x32xf32>
    %42 = vector.extract_strided_slice %19 {offsets = [0, 32], sizes = [24, 32], strides = [1, 1]} : vector<24x128xf32> to vector<24x32xf32>
    %cst_24 = arith.constant dense<0.000000e+00> : vector<16x24xf32>
    %43 = tpu.matmul %40, %41, %cst_24 {dimension_numbers = #tpu.dot_dimension_numbers<[1], [1], [0], [0], [0, 0, 1, 0], [], []>} : vector<16x32xf32>, vector<24x32xf32>, vector<16x24xf32> -> vector<16x24xf32>
    %cst_25 = arith.constant 0.176776692 : f32
    %44 = vector.broadcast %cst_25 : f32 to vector<16x24xf32>
    %45 = arith.mulf %43, %44 : vector<16x24xf32>
    %cst_26 = arith.constant dense<0xFF800000> : vector<16xf32>
    %46 = vector.multi_reduction <maximumf>, %45, %cst_26 [1] : vector<16x24xf32> to vector<16xf32>
    %47 = vector.shape_cast %46 : vector<16xf32> to vector<16x1xf32>
    %48 = vector.broadcast %47 : vector<16x1xf32> to vector<16x24xf32>
    %49 = arith.subf %45, %48 : vector<16x24xf32>
    %50 = math.exp %49 : vector<16x24xf32>
    %cst_27 = arith.constant dense<0.000000e+00> : vector<16xf32>
    %51 = vector.multi_reduction <add>, %50, %cst_27 [1] : vector<16x24xf32> to vector<16xf32>
    %52 = vector.shape_cast %51 : vector<16xf32> to vector<16x1xf32>
    %53 = vector.broadcast %52 : vector<16x1xf32> to vector<16x24xf32>
    %54 = arith.divf %50, %53 : vector<16x24xf32>
    %cst_28 = arith.constant dense<0.000000e+00> : vector<16x32xf32>
    %55 = tpu.matmul %54, %42, %cst_28 {dimension_numbers = #tpu.dot_dimension_numbers<[1], [0], [0], [1], [0, 0, 1, 1], [], []>} : vector<16x24xf32>, vector<24x32xf32>, vector<16x32xf32> -> vector<16x32xf32>
    %56 = vector.extract_strided_slice %7 {offsets = [0, 64], sizes = [16, 32], strides = [1, 1]} : vector<16x128xf32> to vector<16x32xf32>
    %57 = vector.extract_strided_slice %13 {offsets = [0, 64], sizes = [24, 32], strides = [1, 1]} : vector<24x128xf32> to vector<24x32xf32>
    %58 = vector.extract_strided_slice %19 {offsets = [0, 64], sizes = [24, 32], strides = [1, 1]} : vector<24x128xf32> to vector<24x32xf32>
    %cst_29 = arith.constant dense<0.000000e+00> : vector<16x24xf32>
    %59 = tpu.matmul %56, %57, %cst_29 {dimension_numbers = #tpu.dot_dimension_numbers<[1], [1], [0], [0], [0, 0, 1, 0], [], []>} : vector<16x32xf32>, vector<24x32xf32>, vector<16x24xf32> -> vector<16x24xf32>
    %cst_30 = arith.constant 0.176776692 : f32
    %60 = vector.broadcast %cst_30 : f32 to vector<16x24xf32>
    %61 = arith.mulf %59, %60 : vector<16x24xf32>
    %cst_31 = arith.constant dense<0xFF800000> : vector<16xf32>
    %62 = vector.multi_reduction <maximumf>, %61, %cst_31 [1] : vector<16x24xf32> to vector<16xf32>
    %63 = vector.shape_cast %62 : vector<16xf32> to vector<16x1xf32>
    %64 = vector.broadcast %63 : vector<16x1xf32> to vector<16x24xf32>
    %65 = arith.subf %61, %64 : vector<16x24xf32>
    %66 = math.exp %65 : vector<16x24xf32>
    %cst_32 = arith.constant dense<0.000000e+00> : vector<16xf32>
    %67 = vector.multi_reduction <add>, %66, %cst_32 [1] : vector<16x24xf32> to vector<16xf32>
    %68 = vector.shape_cast %67 : vector<16xf32> to vector<16x1xf32>
    %69 = vector.broadcast %68 : vector<16x1xf32> to vector<16x24xf32>
    %70 = arith.divf %66, %69 : vector<16x24xf32>
    %cst_33 = arith.constant dense<0.000000e+00> : vector<16x32xf32>
    %71 = tpu.matmul %70, %58, %cst_33 {dimension_numbers = #tpu.dot_dimension_numbers<[1], [0], [0], [1], [0, 0, 1, 1], [], []>} : vector<16x24xf32>, vector<24x32xf32>, vector<16x32xf32> -> vector<16x32xf32>
    %72 = vector.extract_strided_slice %7 {offsets = [0, 96], sizes = [16, 32], strides = [1, 1]} : vector<16x128xf32> to vector<16x32xf32>
    %73 = vector.extract_strided_slice %13 {offsets = [0, 96], sizes = [24, 32], strides = [1, 1]} : vector<24x128xf32> to vector<24x32xf32>
    %74 = vector.extract_strided_slice %19 {offsets = [0, 96], sizes = [24, 32], strides = [1, 1]} : vector<24x128xf32> to vector<24x32xf32>
    %cst_34 = arith.constant dense<0.000000e+00> : vector<16x24xf32>
    %75 = tpu.matmul %72, %73, %cst_34 {dimension_numbers = #tpu.dot_dimension_numbers<[1], [1], [0], [0], [0, 0, 1, 0], [], []>} : vector<16x32xf32>, vector<24x32xf32>, vector<16x24xf32> -> vector<16x24xf32>
    %cst_35 = arith.constant 0.176776692 : f32
    %76 = vector.broadcast %cst_35 : f32 to vector<16x24xf32>
    %77 = arith.mulf %75, %76 : vector<16x24xf32>
    %cst_36 = arith.constant dense<0xFF800000> : vector<16xf32>
    %78 = vector.multi_reduction <maximumf>, %77, %cst_36 [1] : vector<16x24xf32> to vector<16xf32>
    %79 = vector.shape_cast %78 : vector<16xf32> to vector<16x1xf32>
    %80 = vector.broadcast %79 : vector<16x1xf32> to vector<16x24xf32>
    %81 = arith.subf %77, %80 : vector<16x24xf32>
    %82 = math.exp %81 : vector<16x24xf32>
    %cst_37 = arith.constant dense<0.000000e+00> : vector<16xf32>
    %83 = vector.multi_reduction <add>, %82, %cst_37 [1] : vector<16x24xf32> to vector<16xf32>
    %84 = vector.shape_cast %83 : vector<16xf32> to vector<16x1xf32>
    %85 = vector.broadcast %84 : vector<16x1xf32> to vector<16x24xf32>
    %86 = arith.divf %82, %85 : vector<16x24xf32>
    %cst_38 = arith.constant dense<0.000000e+00> : vector<16x32xf32>
    %87 = tpu.matmul %86, %74, %cst_38 {dimension_numbers = #tpu.dot_dimension_numbers<[1], [0], [0], [1], [0, 0, 1, 1], [], []>} : vector<16x24xf32>, vector<24x32xf32>, vector<16x32xf32> -> vector<16x32xf32>
    %88 = tpu.concatenate %39, %55, %71, %87 in 1 : vector<16x32xf32>, vector<16x32xf32>, vector<16x32xf32>, vector<16x32xf32> -> vector<16x128xf32>
    %cst_39 = arith.constant dense<0.000000e+00> : vector<16x32xf32>
    %89 = tpu.matmul %88, %20, %cst_39 {dimension_numbers = #tpu.dot_dimension_numbers<[1], [0], [0], [1], [0, 0, 1, 1], [], []>} : vector<16x128xf32>, vector<128x32xf32>, vector<16x32xf32> -> vector<16x32xf32>
    %90 = arith.addf %0, %89 : vector<16x32xf32>
    %91 = vector.broadcast %21 : vector<1x32xf32> to vector<16x32xf32>
    %92 = arith.addf %90, %91 : vector<16x32xf32>
    %cst_40 = arith.constant dense<0.000000e+00> : vector<16xf32>
    %93 = vector.multi_reduction <add>, %92, %cst_40 [1] : vector<16x32xf32> to vector<16xf32>
    %94 = vector.shape_cast %93 : vector<16xf32> to vector<16x1xf32>
    %cst_41 = arith.constant 3.200000e+01 : f32
    %95 = vector.broadcast %cst_41 : f32 to vector<16x1xf32>
    %96 = arith.divf %94, %95 : vector<16x1xf32>
    %97 = vector.broadcast %96 : vector<16x1xf32> to vector<16x32xf32>
    %98 = arith.subf %92, %97 : vector<16x32xf32>
    %99 = arith.mulf %98, %98 : vector<16x32xf32>
    %cst_42 = arith.constant dense<0.000000e+00> : vector<16xf32>
    %100 = vector.multi_reduction <add>, %99, %cst_42 [1] : vector<16x32xf32> to vector<16xf32>
    %101 = vector.shape_cast %100 : vector<16xf32> to vector<16x1xf32>
    %cst_43 = arith.constant 3.200000e+01 : f32
    %102 = vector.broadcast %cst_43 : f32 to vector<16x1xf32>
    %103 = arith.divf %101, %102 : vector<16x1xf32>
    %cst_44 = arith.constant 9.99999996E-13 : f32
    %104 = vector.broadcast %cst_44 : f32 to vector<16x1xf32>
    %105 = arith.addf %103, %104 : vector<16x1xf32>
    %106 = math.rsqrt %105 : vector<16x1xf32>
    %107 = vector.broadcast %106 : vector<16x1xf32> to vector<16x32xf32>
    %108 = arith.mulf %98, %107 : vector<16x32xf32>
    %109 = vector.broadcast %22 : vector<1x32xf32> to vector<16x32xf32>
    %110 = arith.mulf %108, %109 : vector<16x32xf32>
    %111 = vector.broadcast %23 : vector<1x32xf32> to vector<16x32xf32>
    %112 = arith.addf %110, %111 : vector<16x32xf32>
    %c0_45 = arith.constant 0 : index
    %c0_46 = arith.constant 0 : index
    %113 = vector.load %arg9[%c0_45, %c0_46] : memref<16x32xf32, #tpu.memory_space<vmem>>, vector<16x32xf32>
    tpu.vector_store %arg9[%c0_45, %c0_46], %112 {strides = array<i32>} : memref<16x32xf32, #tpu.memory_space<vmem>>, vector<16x32xf32>,
    return
  }
}

</mosaic_0001>

<bundles_post_ra>
// kernel: attention_forward.1
= control target key start
LH: loop header
LB: loop body
LE: loop exit
PB: predicated region body
PF: predicated region fallthrough
CT: control target
= control target key end

     0   :  { %14 = vsyncpa [#allocation3], 0  ;;  %s2254_s0 = inlined_call_operand.hbm [shape: f32[16,32], index: 0, kind: input, shape index: {}]   ;;  %s2255_s1 = inlined_call_operand.vmem [shape: f32[24,40], index: 1, kind: input, shape index: {}]   ;;  %s2256_s2 = inlined_call_operand.vmem [shape: f32[24,40], index: 2, kind: input, shape index: {}]   ;;  %s2257_s3 = inlined_call_operand.vmem [shape: f32[32,128], index: 3, kind: input, shape index: {}]   ;;  %s2258_s4 = inlined_call_operand.vmem [shape: f32[40,128], index: 4, kind: input, shape index: {}]   ;;  %s2259_s5 = inlined_call_operand.vmem [shape: f32[40,128], index: 5, kind: input, shape index: {}]   ;;  %s2260_s6 = inlined_call_operand.vmem [shape: f32[128,32], index: 6, kind: input, shape index: {}]   ;;  %s2261_s7 = inlined_call_operand.vmem [shape: f32[3,128], index: 7, kind: input, shape index: {}]   ;;  %s2262_s8 = inlined_call_operand.vmem [shape: f32[3,32], index: 8, kind: input, shape index: {}]   ;;  %s2263_s9 = inlined_call_operand.hbm [shape: f32[16,32], index: 9, kind: output, shape index: {}]  }
   0x1   :  { %15 = vsyncpa [#allocation4], 0  ;;  %s1862_s30 = smov [#allocation2]   ;;  %s1814_s13 = scalar_lea.hbm %s2254_s0, 256 }
   0x2   :  { %s21_s10 = sshll.u32 %s1862_s30, 4  ;;  %p1815_p0 = scmp.ne.s32.totalorder %s2254_s0, %s1814_s13  ;;  %s22_s10 = int_to_ptr.vmem [resolvable:$true] %s21_s10 }
   0x3   :  { %p1818_p1 = scmp.lt.u32.totalorder %s1814_s13, %s2254_s0 }
   0x5   :  { %p1820_p2 = pnand %p1818_p1, %p1815_p0 }
   0x7   :  { %1823 = shalt.err (!%p1820_p2)
}
   0x8   :  { %s1824_s18 = scalar_lea.vmem %s22_s10, 256  ;;  %p1829_p4 = scmp.lt.s32.totalorder %s22_s10, %s22_s10 }
   0x9   :  { %p1825_p3 = scmp.ne.s32.totalorder %s22_s10, %s1824_s18  ;;  %p1830_p5 = scmp.lt.s32.totalorder %s1824_s18, %s1824_s18 }
   0xb   :  { %p1831_p6 = por %p1830_p5, %p1829_p4 }
   0xd   :  { %p1832_p7 = pnand %p1831_p6, %p1825_p3 }
   0xf   :  { %1835 = shalt.err (!%p1832_p7)
}
  0x10   :  { %s1863_s19 = smov 128   ;;  %s1864_s20 = smov 8  }
  0x11   :  { %27 = dma.hbm_to_vmem [thread:$0]  %s2254_s0, 256, %s22_s10, [#allocation3], %s1863_s19, %s1863_s19, %s1864_s20  }
  0x12   :  { %1858 = dma.done.wait [#allocation3], 256  }
  0x13   :  { %1859 = vsyncadd [#allocation3], 4294967040  ;;  %v1865_v0 = vmov 0.0|0.0   ;;  %vm1866_vm0 = vmmov 0   ;;  %v1867_v1 = vmov 0.0   ;;  %v144_v2 = vld [vmem:[%s2258_s4] sm:$0xff]  ;;  %v55_v20 = vlaneseq }
  0x14   :  { %1639 = vmatprep.subr.bf16.mxu1 %v1865_v0  ;;  %1496 = vmatprep.mubr.msk.f32.mxu1 %vm1866_vm0, %v1867_v1  ;;  %v145_v3 = vld [vmem:[%s2258_s4 + $0x8] sm:$0xff]  ;;  %v146_v4 = vld [vmem:[%s2258_s4 + $0x10] sm:$0xff]  ;;  %v147_v6 = vld [vmem:[%s2258_s4 + $0x18] sm:$0xff]  ;;  %vm59_vm1 = vcmask 261120   ;;  %vm153_vm2 = vcmask 326656   ;;  %s1868_s16 = smov 96  }
  0x15   :  { %v1640_v5 = vpack.c.bf16 %v145_v3, %v144_v2  ;;  %v51_v7 = vld [vmem:[%s2257_s3] sm:$0xff]  ;;  %v52_v8 = vld [vmem:[%s2257_s3 + $0x8] sm:$0xff]  ;;  %v1643_v9 = vpack.c.bf16 %v147_v6, %v146_v4  ;;  %v53_v11 = vld [vmem:[%s2257_s3 + $0x10] sm:$0xff]  ;;  %v1993_v21 = vshrl.u32 %v55_v20, 7  ;;  %vm452_vm4 = vcmask 195584   ;;  %s1870_s21 = smov 32  }
  0x16   :  { %v1631_v10 = vpack.c.bf16 %v52_v8, %v51_v7  ;;  %v54_v12 = vld [vmem:[%s2257_s3 + $0x18] sm:$0xff]  ;;  %v1963_v14 = vld [vmem:[#allocation2] sm:$0xff]  ;;  %v1974_v17 = vld [vmem:[#allocation2 + $0x8] sm:$0xff]  ;;  %vm1212_vm5 = vcmask 523264   ;;  %vm1215_vm6 = vcmask 785408  }
  0x17   :  { %1641 = vmatpush3.bf16.msra.mxu1 %v1640_v5  ;;  %v1635_v13 = vpack.c.bf16 %v54_v12, %v53_v11  ;;  %1483 = vmatprep.mubr.msk.f32.mxu0 %vm59_vm1, %v1963_v14  ;;  %v148_v15 = vld [vmem:[%s2258_s4 + $0x20] sm:$0xff]  ;;  %v142_v18 = vld [vmem:[%s2255_s1 + $0x8] sm:$0xff]  ;;  %v143_v19 = vld [vmem:[%s2255_s1 + $0x10] sm:$0xff]  ;;  %v57_v22 = vsub.s32 0, %v1993_v21  ;;  %v151_v23 = vsub.s32 1, %v1993_v21  ;;  %v253_v61 = vsub.s32 2, %v1993_v21 }
  0x18   :  { %1642 = vmatprep.subr.bf16.mxu1 %v1865_v0  ;;  %1632 = vmatprep.subr.bf16.mxu0 %v1631_v10  ;;  %v141_v16 = vld [vmem:[%s2255_s1] sm:$0xff]  ;;  %v247_v25 = vld [vmem:[%s2259_s5 + $0x8] sm:$0xff]  ;;  %v248_v26 = vld [vmem:[%s2259_s5 + $0x10] sm:$0xff] }
  0x19   :  { %1634 = vmatpush3.bf16.msra.mxu0 %v1631_v10  ;;  %v246_v24 = vld [vmem:[%s2259_s5] sm:$0xff]  ;;  %v249_v29 = vld [vmem:[%s2259_s5 + $0x18] sm:$0xff]  ;;  %vm2026_vm3 = vmpackc.low %vm59_vm1, %vm59_vm1 }
  0x1a   :  { %1636 = vmatprep.subr.bf16.mxu0 %v1635_v13  ;;  %v49_v27 = vld [vmem:[%s2261_s7] sm:$0x7]  ;;  %v1646_v28 = vpack.c.bf16 %v247_v25, %v246_v24  ;;  %v1649_v32 = vpack.c.bf16 %v249_v29, %v248_v26  ;;  %v244_v50 = vld [vmem:[%s2256_s2 + $0x8] sm:$0xff]  ;;  %v245_v51 = vld [vmem:[%s2256_s2 + $0x10] sm:$0xff] }
  0x1b   :  { %1644 = vmatpush3.bf16.msra.mxu1 %v1643_v9  ;;  %v58_v30 = vrot.slane %v49_v27, %v57_v22  ;;  %v152_v33 = vrot.slane %v49_v27, %v151_v23  ;;  %v250_v42 = vld [vmem:[%s2259_s5 + $0x20] sm:$0xff]  ;;  %v254_v62 = vrot.slane %v49_v27, %v253_v61 }
  0x1c   :  { %1494 = vmatprep.subr.mxu1 %v1867_v1  ;;  %v243_v44 = vld [vmem:[%s2256_s2] sm:$0xff]  ;;  %s1869_s2 = smov 64  }
  0x1d   :  { %1638 = vmatpush3.bf16.msra.mxu0 %v1635_v13 }
  0x1e   :  { %1645 = vmatprep.subr.bf16.mxu0 %v1865_v0 }
  0x1f   :  { %1495 = vmatpush3.msra.mxu1 %v148_v15 }
  0x20   :  { %1497 = vmatmul.mubr.msk.f32.vlgmr.msra.gmra.mrb[0].mxu1 %vm153_vm2, %v141_v16  ;;  %1484 = vmatmul.mubr.msk.f32.vlgmr.msra.gmra.mrb[0].mxu0 %vm59_vm1, %v1974_v17 }
  0x21   :  { %1499 = vmatprep.mubr.msk.f32.mxu1 %vm1866_vm0, %v1867_v1  ;;  %1515 = vmatprep.mubr.msk.f32.mxu0 %vm1866_vm0, %v1867_v1 }
  0x22   :  { %1647 = vmatpush3.bf16.msra.mxu0 %v1646_v28 }
  0x23   :  { %1648 = vmatprep.subr.bf16.mxu0 %v1865_v0 }
  0x24   :  { %1500 = vmatmul.mubr.msk.f32.gmra.mrb[2].mxu1 %vm153_vm2, %v142_v18 }
  0x25   :  { %1502 = vmatprep.mubr.msk.f32.mxu1 %vm1866_vm0, %v1867_v1 }
  0x26   :  { %1650 = vmatpush3.bf16.msra.mxu0 %v1649_v32 }
  0x27   :  { %1513 = vmatprep.subr.mxu0 %v1867_v1 }
  0x28   :  { %1503 = vmatmul.mubr.msk.f32.gmra.mrb[4].mxu1 %vm153_vm2, %v143_v19 }
  0x2a   :  { %1514 = vmatpush3.msra.mxu0 %v250_v42 }
  0x2b   :  { %1516 = vmatmul.mubr.msk.f32.vlgmr.msra.gmra.mrb[2].mxu0 %vm153_vm2, %v243_v44 }
  0x2c   :  { %1518 = vmatprep.mubr.msk.f32.mxu0 %vm1866_vm0, %v1867_v1 }
  0x2f   :  { %1519 = vmatmul.mubr.msk.f32.gmra.mrb[4].mxu0 %vm153_vm2, %v244_v50 }
  0x30   :  { %1521 = vmatprep.mubr.msk.f32.mxu0 %vm1866_vm0, %v1867_v1 }
  0x33   :  { %1522 = vmatmul.mubr.msk.f32.gmra.mrb[6].mxu0 %vm153_vm2, %v245_v51 }
  0xf3   :  { %v229_v31 = vpop.f32.mrb[0].mxu1  ;;  %v1485_v35 = vpop.f32.mrb[0].mxu0 }
  0xf4   :  { %v1498_v34 = vpop.f32.mrb[1].mxu1  ;;  %v132_v36 = vpop.f32.mrb[1].mxu0  ;;  %v230_v39 = vadd.f32 %v229_v31, %v152_v33  ;;  %v2060_v52 = vadd.f32 %v1485_v35, %v58_v30 }
  0xf5   :  { %v2016_v37 = vadd.f32 %v132_v36, %v58_v30 }
  0xf7   :  { %v234_v38 = vpop.f32.mrb[2].mxu1  ;;  %1530 = vmatprep.mubr.msk.f32.mxu1 %vm59_vm1, %v2016_v37 }
  0xf8   :  { %v235_v40 = vadd.f32 %v234_v38, %v152_v33  ;;  %v1501_v41 = vpop.f32.mrb[3].mxu1 }
  0xfa   :  { %v1651_v45 = vpack.c.bf16 %v235_v40, %v230_v39  ;;  %v2033_v46 = vpack.i.bf16 %v235_v40, %v230_v39 }
  0xfb   :  { %v239_v47 = vpop.f32.mrb[4].mxu1 }
  0xfc   :  { %1653 = vmatprep.subr.msk.bf16.mxu1 %vm2026_vm3, %v1651_v45  ;;  %v2037_v48 = vadd.f32 %v239_v47, %v152_v33  ;;  %v1504_v49 = vpop.f32.mrb[5].mxu1 }
  0xfd   :  { %1656 = vmatpush3.bf16.xpose.msk.msra.mxu1 %vm2026_vm3, %v1651_v45 }
  0xfe   :  { %564 = vrot.lane.b32.xlu1 %v2037_v48, %s1868_s16  ;;  %1528 = vmatprep.subr.msk.mxu1 %vm59_vm1, %v2037_v48  ;;  %v330_v53 = vpop.f32.mrb[2].mxu0 }
  0xff   :  { %v1517_v54 = vpop.f32.mrb[3].mxu0  ;;  %v2069_v63 = vadd.f32 %v330_v53, %v254_v62 }
 0x102   :  { %v335_v0 = vpop.f32.mrb[4].mxu0 }
 0x103   :  { %v2071_v1 = vadd.f32 %v335_v0, %v254_v62  ;;  %v1520_v2 = vpop.f32.mrb[5].mxu0 }
 0x105   :  { %1529 = vmatpush3.xpose.msk.msra.mxu1 %vm59_vm1, %v2037_v48  ;;  %v1657_v3 = vpack.c.bf16 %v2071_v1, %v2069_v63 }
 0x106   :  { %v340_v4 = vpop.f32.mrb[6].mxu0 }
 0x107   :  { %1658 = vmatprep.subr.bf16.mxu1 %v1657_v3  ;;  %v2075_v5 = vadd.f32 %v340_v4, %v254_v62  ;;  %v1523_v6 = vpop.f32.mrb[7].mxu0 }
 0x108   :  { %1531 = vmatmul.mubr.msk.f32.vlgmr.msra.gmra.mrb[6].mxu1 %vm59_vm1, %v2060_v52 }
 0x109   :  { %1660 = vmatpush3.bf16.msra.mxu1 %v1657_v3 }
 0x10a   :  { %1537 = vmatprep.subr.mxu1 %v2075_v5 }
 0x10d   :  { %1538 = vmatpush3.msra.mxu1 %v2075_v5 }
 0x170   :  { %v565_v28 = vpop.permute.xlu1 %564 }
 0x1db   :  { %v1532_v55 = vpop.f32.mrb[6].mxu1 }
 0x1dc   :  { %v441_v56 = vpop.f32.mrb[7].mxu1  ;;  %v451_v58 = vmul.f32 0.17677669, %v1532_v55 }
 0x1dd   :  { %v450_v57 = vmul.f32 0.17677669, %v441_v56 }
 0x1de   :  { %v456_v60 = vsel %vm452_vm4, %v451_v58, -inf }
 0x1df   :  { %v453_v59 = vsel %vm452_vm4, %v450_v57, -inf }
 0x1e0   :  { %454 = vmax.xlane.f32.xlu0 %v453_v59 }
 0x1e4   :  { %457 = vmax.xlane.f32.xlu0 %v456_v60 }
 0x1fa   :  { %1734 = vrot.lane.b32.xlu0 %v2033_v46, %s1868_s16 }
 0x1fe   :  { %558 = vrot.lane.b32.xlu0 %v2060_v52, %s1868_s16 }
 0x202   :  { %768 = vrot.lane.b32.xlu0 %v2016_v37, %s1869_s2 }
 0x26d   :  { %v455_v7 = vpop.xlane.xlu0 %454 }
 0x26e   :  { %v459_v8 = vsub.f32 %v450_v57, %v455_v7 }
 0x270   :  { %v461_v11 = vmul.f32 1.442695, %v459_v8 }
 0x271   :  { %v458_v9 = vpop.xlane.xlu0 %457 }
 0x272   :  { %v460_v10 = vsub.f32 %v451_v58, %v458_v9 }
 0x274   :  { %v463_v12 = vmul.f32 1.442695, %v460_v10 }
 0x275   :  { %v1735_v13 = vpop.permute.xlu0 %1734 }
 0x276   :  { %1778 = vpow2.f32 %v463_v12  ;;  %v1737_v15 = vunpack.i.h.bf16 %v1735_v13  ;;  %v1736_v16 = vunpack.i.l.bf16 %v1735_v13 }
 0x277   :  { %1780 = vpow2.f32 %v461_v11 }
 0x278   :  { %v1661_v18 = vpack.c.bf16 %v1737_v15, %v1736_v16 }
 0x279   :  { %v559_v19 = vpop.permute.xlu0 %558 }
 0x27a   :  { %1663 = vmatprep.subr.msk.bf16.mxu1 %vm2026_vm3, %v1661_v18 }
 0x27d   :  { %v769_v20 = vpop.permute.xlu0 %768 }
 0x27e   :  { %1566 = vmatprep.mubr.msk.f32.mxu0 %vm59_vm1, %v769_v20 }
 0x280   :  { %v1779_v24 = vpop.eup %1778 }
 0x281   :  { %v468_v25 = vsel %vm452_vm4, %v1779_v24, 0.0  ;;  %v1781_v26 = vpop.eup %1780 }
 0x282   :  { %469 = vadd.xlane.f32.xlu1 %v468_v25  ;;  %v465_v27 = vsel %vm452_vm4, %v1781_v26, 0.0 }
 0x286   :  { %466 = vadd.xlane.f32.xlu1 %v465_v27 }
 0x297   :  { %1739 = vrot.lane.b32.xlu1 %v2033_v46, %s1869_s2 }
 0x29b   :  { %556 = vrot.lane.b32.xlu1 %v2016_v37, %s1868_s16 }
 0x29f   :  { %776 = vrot.lane.b32.xlu1 %v2037_v48, %s1869_s2 }
 0x2a3   :  { %770 = vrot.lane.b32.xlu1 %v2060_v52, %s1869_s2 }
 0x30f   :  { %v470_v29 = vpop.xlane.xlu1 %469 }
 0x310   :  { %1782 = vrcp.f32 %v470_v29 }
 0x313   :  { %v467_v30 = vpop.xlane.xlu1 %466 }
 0x314   :  { %1784 = vrcp.f32 %v467_v30 }
 0x317   :  { %v1740_v31 = vpop.permute.xlu1 %1739 }
 0x318   :  { %v1742_v32 = vunpack.i.h.bf16 %v1740_v31  ;;  %v1741_v33 = vunpack.i.l.bf16 %v1740_v31 }
 0x31a   :  { %v1671_v34 = vpack.c.bf16 %v1742_v32, %v1741_v33  ;;  %v1783_v36 = vpop.eup %1782 }
 0x31b   :  { %v557_v35 = vpop.permute.xlu1 %556  ;;  %v474_v41 = vmul.f32 %v1783_v36, %v1779_v24 }
 0x31c   :  { %1673 = vmatprep.subr.msk.bf16.mxu0 %vm2026_vm3, %v1671_v34 }
 0x31d   :  { %1676 = vmatpush3.bf16.xpose.msk.msra.mxu0 %vm2026_vm3, %v1671_v34 }
 0x31e   :  { %v1785_v38 = vpop.eup %1784 }
 0x31f   :  { %v777_v39 = vpop.permute.xlu1 %776  ;;  %v472_v40 = vmul.f32 %v1785_v38, %v1781_v26  ;;  %v2127_v26 = vpack.i.bf16 %v2071_v1, %v2069_v63 }
 0x320   :  { %1564 = vmatprep.subr.msk.mxu0 %vm59_vm1, %v777_v39 }
 0x321   :  { %1539 = vmatprep.mubr.msk.f32.mxu1 %vm452_vm4, %v472_v40 }
 0x322   :  { %1540 = vmatmul.mubr.msk.f32.vlgmr.msra.gmra.mrb[8].mxu1 %vm452_vm4, %v474_v41 }
 0x323   :  { %1666 = vmatpush3.bf16.xpose.msk.msra.mxu1 %vm2026_vm3, %v1661_v18  ;;  %1548 = vmatprep.mubr.msk.f32.mxu1 %vm59_vm1, %v557_v35  ;;  %v771_v42 = vpop.permute.xlu1 %770 }
 0x324   :  { %1546 = vmatprep.subr.msk.mxu1 %vm59_vm1, %v565_v28 }
 0x325   :  { %1565 = vmatpush3.xpose.msk.msra.mxu0 %vm59_vm1, %v777_v39 }
 0x328   :  { %1567 = vmatmul.mubr.msk.f32.vlgmr.msra.gmra.mrb[8].mxu0 %vm59_vm1, %v771_v42 }
 0x32b   :  { %1547 = vmatpush3.xpose.msk.msra.mxu1 %vm59_vm1, %v565_v28 }
 0x32e   :  { %1549 = vmatmul.mubr.msk.f32.vlgmr.msra.gmra.mrb[10].mxu1 %vm59_vm1, %v559_v19 }
 0x3f5   :  { %v2113_v44 = vpop.f32.mrb[8].mxu1 }
 0x3f6   :  { %v2115_v45 = vpop.f32.mrb[9].mxu1 }
 0x3fb   :  { %v1568_v47 = vpop.f32.mrb[8].mxu0 }
 0x3fc   :  { %v854_v49 = vpop.f32.mrb[9].mxu0  ;;  %v864_v58 = vmul.f32 0.17677669, %v1568_v47 }
 0x3fd   :  { %v863_v56 = vmul.f32 0.17677669, %v854_v49 }
 0x3fe   :  { %v868_v60 = vsel %vm452_vm4, %v864_v58, -inf }
 0x3ff   :  { %v865_v59 = vsel %vm452_vm4, %v863_v56, -inf }
 0x401   :  { %v1550_v50 = vpop.f32.mrb[10].mxu1 }
 0x402   :  { %v652_v51 = vmul.f32 0.17677669, %v1550_v50  ;;  %v642_v53 = vpop.f32.mrb[11].mxu1 }
 0x403   :  { %v651_v54 = vmul.f32 0.17677669, %v642_v53 }
 0x404   :  { %v656_v55 = vsel %vm452_vm4, %v652_v51, -inf }
 0x405   :  { %657 = vmax.xlane.f32.xlu1 %v656_v55  ;;  %v653_v57 = vsel %vm452_vm4, %v651_v54, -inf }
 0x406   :  { %654 = vmax.xlane.f32.xlu0 %v653_v57 }
 0x40a   :  { %866 = vmax.xlane.f32.xlu0 %v865_v59 }
 0x40e   :  { %869 = vmax.xlane.f32.xlu0 %v868_v60 }
 0x492   :  { %v658_v2 = vpop.xlane.xlu1 %657 }
 0x493   :  { %v655_v62 = vpop.xlane.xlu0 %654  ;;  %v660_v6 = vsub.f32 %v652_v51, %v658_v2 }
 0x494   :  { %v659_v0 = vsub.f32 %v651_v54, %v655_v62 }
 0x495   :  { %v663_v11 = vmul.f32 1.442695, %v660_v6 }
 0x496   :  { %v661_v7 = vmul.f32 1.442695, %v659_v0 }
 0x497   :  { %v867_v3 = vpop.xlane.xlu0 %866 }
 0x498   :  { %v871_v4 = vsub.f32 %v863_v56, %v867_v3 }
 0x49a   :  { %v873_v8 = vmul.f32 1.442695, %v871_v4 }
 0x49b   :  { %v870_v9 = vpop.xlane.xlu0 %869 }
 0x49c   :  { %1786 = vpow2.f32 %v873_v8  ;;  %v872_v10 = vsub.f32 %v864_v58, %v870_v9 }
 0x49d   :  { %1788 = vpow2.f32 %v661_v7 }
 0x49e   :  { %v875_v12 = vmul.f32 1.442695, %v872_v10 }
 0x4a0   :  { %1790 = vpow2.f32 %v875_v12 }
 0x4a1   :  { %1792 = vpow2.f32 %v663_v11 }
 0x4a6   :  { %v1787_v13 = vpop.eup %1786 }
 0x4a7   :  { %v877_v15 = vsel %vm452_vm4, %v1787_v13, 0.0  ;;  %v1789_v16 = vpop.eup %1788 }
 0x4a8   :  { %878 = vadd.xlane.f32.xlu0 %v877_v15  ;;  %v665_v19 = vsel %vm452_vm4, %v1789_v16, 0.0 }
 0x4aa   :  { %v1791_v18 = vpop.eup %1790 }
 0x4ab   :  { %v880_v20 = vsel %vm452_vm4, %v1791_v18, 0.0  ;;  %v1793_v24 = vpop.eup %1792 }
 0x4ac   :  { %666 = vadd.xlane.f32.xlu0 %v665_v19  ;;  %881 = vadd.xlane.f32.xlu1 %v880_v20  ;;  %v668_v25 = vsel %vm452_vm4, %v1793_v24, 0.0 }
 0x4b0   :  { %669 = vadd.xlane.f32.xlu1 %v668_v25 }
 0x4c1   :  { %682 = vrot.lane.b32.xlu1 %v2075_v5, %s1868_s16 }
 0x4c2   :  { %1744 = vrot.lane.b32.xlu0 %v2127_v26, %s1868_s16 }
 0x4c5   :  { %1749 = vrot.lane.b32.xlu1 %v2127_v26, %s1869_s2 }
 0x4c6   :  { %1754 = vrot.lane.b32.xlu0 %v2033_v46, %s1870_s21 }
 0x4c9   :  { %891 = vrot.lane.b32.xlu1 %v2075_v5, %s1869_s2 }
 0x4ca   :  { %977 = vrot.lane.b32.xlu0 %v2016_v37, %s1870_s21 }
 0x4cd   :  { %985 = vrot.lane.b32.xlu1 %v2037_v48, %s1870_s21 }
 0x4d1   :  { %979 = vrot.lane.b32.xlu1 %v2060_v52, %s1870_s21 }
 0x535   :  { %v879_v63 = vpop.xlane.xlu0 %878 }
 0x539   :  { %v882_v1 = vpop.xlane.xlu1 %881  ;;  %v667_v27 = vpop.xlane.xlu0 %666 }
 0x53a   :  { %1794 = vrcp.f32 %v667_v27 }
 0x53b   :  { %1796 = vrcp.f32 %v879_v63 }
 0x53d   :  { %v670_v28 = vpop.xlane.xlu1 %669  ;;  %v1745_v29 = vpop.permute.xlu0 %1744 }
 0x53e   :  { %1798 = vrcp.f32 %v670_v28  ;;  %v1747_v46 = vunpack.i.h.bf16 %v1745_v29  ;;  %v1746_v30 = vunpack.i.l.bf16 %v1745_v29 }
 0x53f   :  { %1800 = vrcp.f32 %v882_v1 }
 0x540   :  { %v1667_v31 = vpack.c.bf16 %v1747_v46, %v1746_v30 }
 0x541   :  { %v683_v32 = vpop.permute.xlu1 %682  ;;  %v1755_v38 = vpop.permute.xlu0 %1754 }
 0x542   :  { %1668 = vmatprep.subr.bf16.mxu1 %v1667_v31  ;;  %v1757_v42 = vunpack.i.h.bf16 %v1755_v38  ;;  %v1756_v47 = vunpack.i.l.bf16 %v1755_v38  ;;  %v351_v38 = vld [vmem:[%s2260_s6 + $0x38] sm:$0xff] }
 0x543   :  { %1670 = vmatpush3.bf16.msra.mxu1 %v1667_v31  ;;  %v345_v31 = vld [vmem:[%s2260_s6 + $0x8] sm:$0xff] }
 0x544   :  { %1555 = vmatprep.subr.mxu1 %v683_v32  ;;  %v1795_v37 = vpop.eup %1794  ;;  %v1681_v53 = vpack.c.bf16 %v1757_v42, %v1756_v47  ;;  %v354_v47 = vld [vmem:[%s2260_s6 + $0x50] sm:$0xff] }
 0x545   :  { %v1750_v48 = vpop.permute.xlu1 %1749  ;;  %v672_v34 = vmul.f32 %v1795_v37, %v1789_v16  ;;  %v1797_v35 = vpop.eup %1796 }
 0x546   :  { %v1752_v33 = vunpack.i.h.bf16 %v1750_v48  ;;  %v1751_v52 = vunpack.i.l.bf16 %v1750_v48  ;;  %v884_v41 = vmul.f32 %v1797_v35, %v1787_v13  ;;  %v978_v54 = vpop.permute.xlu0 %977  ;;  %v347_v48 = vld [vmem:[%s2260_s6 + $0x18] sm:$0xff] }
 0x547   :  { %1556 = vmatpush3.msra.mxu1 %v683_v32  ;;  %1557 = vmatprep.mubr.msk.f32.mxu1 %vm452_vm4, %v672_v34  ;;  %v346_v32 = vld [vmem:[%s2260_s6 + $0x10] sm:$0xff]  ;;  %v349_v34 = vld [vmem:[%s2260_s6 + $0x28] sm:$0xff] }
 0x548   :  { %v1799_v36 = vpop.eup %1798  ;;  %v1677_v39 = vpack.c.bf16 %v1752_v33, %v1751_v52  ;;  %v1695_v33 = vpack.c.bf16 %v347_v48, %v346_v32  ;;  %v348_v52 = vld [vmem:[%s2260_s6 + $0x20] sm:$0xff] }
 0x549   :  { %v674_v40 = vmul.f32 %v1799_v36, %v1793_v24  ;;  %v1801_v49 = vpop.eup %1800  ;;  %v892_v50 = vpop.permute.xlu1 %891  ;;  %v1699_v35 = vpack.c.bf16 %v349_v34, %v348_v52  ;;  %v350_v36 = vld [vmem:[%s2260_s6 + $0x30] sm:$0xff] }
 0x54a   :  { %1678 = vmatprep.subr.bf16.mxu1 %v1677_v39  ;;  %v886_v51 = vmul.f32 %v1801_v49, %v1791_v18  ;;  %v355_v49 = vld [vmem:[%s2260_s6 + $0x58] sm:$0xff] }
 0x54b   :  { %1558 = vmatmul.mubr.msk.f32.vlgmr.msra.gmra.mrb[12].mxu1 %vm452_vm4, %v674_v40  ;;  %v352_v40 = vld [vmem:[%s2260_s6 + $0x40] sm:$0xff] }
 0x54c   :  { %1680 = vmatpush3.bf16.msra.mxu1 %v1677_v39  ;;  %1575 = vmatprep.mubr.msk.f32.mxu1 %vm452_vm4, %v884_v41  ;;  %v1703_v39 = vpack.c.bf16 %v351_v38, %v350_v36  ;;  %v353_v41 = vld [vmem:[%s2260_s6 + $0x48] sm:$0xff] }
 0x54d   :  { %1573 = vmatprep.subr.mxu1 %v892_v50  ;;  %v986_v55 = vpop.permute.xlu1 %985  ;;  %v1707_v42 = vpack.c.bf16 %v353_v41, %v352_v40 }
 0x550   :  { %1574 = vmatpush3.msra.mxu1 %v892_v50  ;;  %v1711_v50 = vpack.c.bf16 %v355_v49, %v354_v47 }
 0x551   :  { %1576 = vmatmul.mubr.msk.f32.vlgmr.msra.gmra.mrb[14].mxu1 %vm452_vm4, %v886_v51  ;;  %1683 = vmatprep.subr.msk.bf16.mxu1 %vm2026_vm3, %v1681_v53  ;;  %v980_v56 = vpop.permute.xlu1 %979  ;;  %v356_v51 = vld [vmem:[%s2260_s6 + $0x60] sm:$0xff] }
 0x552   :  { %1584 = vmatprep.mubr.msk.f32.mxu1 %vm59_vm1, %v978_v54 }
 0x557   :  { %1686 = vmatpush3.bf16.xpose.msk.msra.mxu1 %vm2026_vm3, %v1681_v53  ;;  %v357_v53 = vld [vmem:[%s2260_s6 + $0x68] sm:$0xff] }
 0x558   :  { %1582 = vmatprep.subr.msk.mxu1 %vm59_vm1, %v986_v55  ;;  %v1715_v54 = vpack.c.bf16 %v357_v53, %v356_v51 }
 0x55f   :  { %1583 = vmatpush3.xpose.msk.msra.mxu1 %vm59_vm1, %v986_v55  ;;  %v358_v55 = vld [vmem:[%s2260_s6 + $0x70] sm:$0xff] }
 0x562   :  { %1585 = vmatmul.mubr.msk.f32.vlgmr.msra.gmra.mrb[16].mxu1 %vm59_vm1, %v980_v56  ;;  %v359_v56 = vld [vmem:[%s2260_s6 + $0x78] sm:$0xff] }
 0x61e   :  { %v1559_v57 = vpop.f32.mrb[12].mxu1 }
 0x61f   :  { %v759_v58 = vpop.f32.mrb[13].mxu1 }
 0x620   :  { %v1763_v59 = vpack.i.bf16 %v1559_v57, %v759_v58  ;;  %v1719_v57 = vpack.c.bf16 %v359_v56, %v358_v55 }
 0x624   :  { %v1577_v60 = vpop.f32.mrb[14].mxu1 }
 0x625   :  { %v968_v62 = vpop.f32.mrb[15].mxu1 }
 0x626   :  { %v1768_v0 = vpack.i.bf16 %v1577_v60, %v968_v62 }
 0x635   :  { %v1586_v2 = vpop.f32.mrb[16].mxu1 }
 0x636   :  { %v1073_v3 = vmul.f32 0.17677669, %v1586_v2  ;;  %v1063_v4 = vpop.f32.mrb[17].mxu1 }
 0x637   :  { %v1072_v6 = vmul.f32 0.17677669, %v1063_v4 }
 0x638   :  { %v1077_v43 = vsel %vm452_vm4, %v1073_v3, -inf }
 0x639   :  { %1078 = vmax.xlane.f32.xlu1 %v1077_v43  ;;  %v1074_v7 = vsel %vm452_vm4, %v1072_v6, -inf }
 0x63a   :  { %1075 = vmax.xlane.f32.xlu0 %v1074_v7 }
 0x64a   :  { %1100 = vrot.lane.b32.xlu1 %v2075_v5, %s1870_s21 }
 0x64e   :  { %1764 = vrot.lane.b32.xlu1 %v1763_v59, %s1870_s21 }
 0x652   :  { %1769 = vrot.lane.b32.xlu1 %v1768_v0, %s1869_s2 }
 0x6c6   :  { %v1079_v8 = vpop.xlane.xlu1 %1078 }
 0x6c7   :  { %v1081_v9 = vsub.f32 %v1073_v3, %v1079_v8  ;;  %v1076_v10 = vpop.xlane.xlu0 %1075 }
 0x6c8   :  { %v1080_v11 = vsub.f32 %v1072_v6, %v1076_v10 }
 0x6c9   :  { %v1084_v12 = vmul.f32 1.442695, %v1081_v9 }
 0x6ca   :  { %v1082_v13 = vmul.f32 1.442695, %v1080_v11  ;;  %v1101_v28 = vpop.permute.xlu1 %1100 }
 0x6cb   :  { %1802 = vpow2.f32 %v1084_v12 }
 0x6cc   :  { %1804 = vpow2.f32 %v1082_v13 }
 0x6ce   :  { %v1765_v62 = vpop.permute.xlu1 %1764 }
 0x6cf   :  { %v1767_v2 = vunpack.i.h.bf16 %v1765_v62  ;;  %v1766_v3 = vunpack.i.l.bf16 %v1765_v62 }
 0x6d1   :  { %v1211_v7 = vsel %vm59_vm1, %v2113_v44, %v1767_v2  ;;  %v1210_v10 = vsel %vm59_vm1, %v2115_v45, %v1766_v3 }
 0x6d2   :  { %v1770_v0 = vpop.permute.xlu1 %1769 }
 0x6d3   :  { %v1772_v4 = vunpack.i.h.bf16 %v1770_v0  ;;  %v1771_v6 = vunpack.i.l.bf16 %v1770_v0 }
 0x6d5   :  { %v1803_v15 = vpop.eup %1802  ;;  %v1213_v11 = vsel %vm1212_vm5, %v1210_v10, %v1771_v6  ;;  %v1214_v12 = vsel %vm1212_vm5, %v1211_v7, %v1772_v4 }
 0x6d6   :  { %v1089_v16 = vsel %vm452_vm4, %v1803_v15, 0.0  ;;  %v1805_v18 = vpop.eup %1804 }
 0x6d7   :  { %1090 = vadd.xlane.f32.xlu0 %v1089_v16  ;;  %v1086_v19 = vsel %vm452_vm4, %v1805_v18, 0.0  ;;  %v50_v16 = vld [vmem:[%s2262_s8] sm:$0x7]  ;;  %s1871_s8 = smov [#allocation5]  }
 0x6d8   :  { %v1331_v34 = vrot.slane %v50_v16, %v151_v23  ;;  %v1337_v36 = vrot.slane %v50_v16, %v253_v61  ;;  %s1347_s27 = sshll.u32 %s1871_s8, 4  ;;  %s1348_s27 = int_to_ptr.vmem [resolvable:$true] %s1347_s27 }
 0x6d9   :  { %s1836_s28 = scalar_lea.vmem %s1348_s27, 256  ;;  %p1841_p9 = scmp.lt.s32.totalorder %s1348_s27, %s1348_s27 }
 0x6da   :  { %p1837_p8 = scmp.ne.s32.totalorder %s1348_s27, %s1836_s28  ;;  %p1842_p10 = scmp.lt.s32.totalorder %s1836_s28, %s1836_s28 }
 0x6db   :  { %1087 = vadd.xlane.f32.xlu0 %v1086_v19 }
 0x6dc   :  { %p1843_p11 = por %p1842_p10, %p1841_p9 }
 0x6de   :  { %p1844_p12 = pnand %p1843_p11, %p1837_p8 }
 0x6f1   :  { %1759 = vrot.lane.b32.xlu0 %v2127_v26, %s1870_s21  ;;  %v344_v26 = vld [vmem:[%s2260_s6] sm:$0xff] }
 0x6f2   :  { %v1691_v37 = vpack.c.bf16 %v345_v31, %v344_v26 }
 0x764   :  { %v1091_v5 = vpop.xlane.xlu0 %1090 }
 0x765   :  { %1806 = vrcp.f32 %v1091_v5 }
 0x768   :  { %v1088_v20 = vpop.xlane.xlu0 %1087 }
 0x769   :  { %1808 = vrcp.f32 %v1088_v20 }
 0x76c   :  { %v1760_v24 = vpop.permute.xlu0 %1759 }
 0x76d   :  { %v1762_v25 = vunpack.i.h.bf16 %v1760_v24  ;;  %v1761_v63 = vunpack.i.l.bf16 %v1760_v24 }
 0x76f   :  { %v1687_v1 = vpack.c.bf16 %v1762_v25, %v1761_v63  ;;  %v1807_v27 = vpop.eup %1806 }
 0x770   :  { %v1095_v30 = vmul.f32 %v1807_v27, %v1803_v15 }
 0x771   :  { %1688 = vmatprep.subr.bf16.mxu0 %v1687_v1 }
 0x772   :  { %1690 = vmatpush3.bf16.msra.mxu0 %v1687_v1 }
 0x773   :  { %v1809_v29 = vpop.eup %1808  ;;  %1591 = vmatprep.subr.mxu0 %v1101_v28 }
 0x774   :  { %v1093_v46 = vmul.f32 %v1809_v29, %v1805_v18  ;;  %v1298_v18 = vrot.slane %v50_v16, %v57_v22 }
 0x776   :  { %1592 = vmatpush3.msra.mxu0 %v1101_v28  ;;  %1593 = vmatprep.mubr.msk.f32.mxu0 %vm452_vm4, %v1093_v46 }
 0x777   :  { %1594 = vmatmul.mubr.msk.f32.vlgmr.msra.gmra.mrb[10].mxu0 %vm452_vm4, %v1095_v30  ;;  %1692 = vmatprep.subr.bf16.mxu0 %v1691_v37 }
 0x778   :  { %1694 = vmatpush3.bf16.msra.mxu0 %v1691_v37 }
 0x779   :  { %1696 = vmatprep.subr.bf16.mxu0 %v1695_v33 }
 0x77c   :  { %1698 = vmatpush3.bf16.msra.mxu0 %v1695_v33 }
 0x77d   :  { %1700 = vmatprep.subr.bf16.mxu0 %v1699_v35 }
 0x780   :  { %1702 = vmatpush3.bf16.msra.mxu0 %v1699_v35 }
 0x781   :  { %1704 = vmatprep.subr.bf16.mxu0 %v1703_v39 }
 0x784   :  { %1706 = vmatpush3.bf16.msra.mxu0 %v1703_v39 }
 0x785   :  { %1708 = vmatprep.subr.bf16.mxu0 %v1707_v42 }
 0x788   :  { %1710 = vmatpush3.bf16.msra.mxu0 %v1707_v42 }
 0x789   :  { %1712 = vmatprep.subr.bf16.mxu0 %v1711_v50 }
 0x78c   :  { %1714 = vmatpush3.bf16.msra.mxu0 %v1711_v50 }
 0x78d   :  { %1716 = vmatprep.subr.bf16.mxu0 %v1715_v54 }
 0x790   :  { %1718 = vmatpush3.bf16.msra.mxu0 %v1715_v54 }
 0x791   :  { %1720 = vmatprep.subr.bf16.mxu0 %v1719_v57 }
 0x794   :  { %1722 = vmatpush3.bf16.msra.mxu0 %v1719_v57 }
 0x84a   :  { %v1595_v58 = vpop.f32.mrb[10].mxu0 }
 0x84b   :  { %v1177_v59 = vpop.f32.mrb[11].mxu0 }
 0x84c   :  { %v1773_v60 = vpack.i.bf16 %v1595_v58, %v1177_v59 }
 0x84e   :  { %1774 = vrot.lane.b32.xlu0 %v1773_v60, %s1868_s16 }
 0x8c0   :  { %v1775_v43 = vpop.permute.xlu0 %1774 }
 0x8c1   :  { %v1777_v8 = vunpack.i.h.bf16 %v1775_v43  ;;  %v1776_v9 = vunpack.i.l.bf16 %v1775_v43 }
 0x8c3   :  { %v1216_v13 = vsel %vm1215_vm6, %v1213_v11, %v1776_v9  ;;  %v1217_v15 = vsel %vm1215_vm6, %v1214_v12, %v1777_v8 }
 0x8c4   :  { %1628 = vmatprep.mubr.f32.mxu0 %v1216_v13 }
 0x8c5   :  { %1629 = vmatmul.mubr.f32.vlgmr.msra.gmra.mrb[12].mxu0 %v1217_v15 }
 0x998   :  { %v1630_v19 = vpop.f32.mrb[12].mxu0 }
 0x999   :  { %v1294_v44 = vadd.f32 %v1630_v19, %v1974_v17  ;;  %v1284_v5 = vpop.f32.mrb[13].mxu0 }
 0x99a   :  { %v1293_v20 = vadd.f32 %v1284_v5, %v1963_v14 }
 0x99b   :  { %v1300_v45 = vadd.f32 %v1298_v18, %v1294_v44 }
 0x99c   :  { %v1299_v24 = vadd.f32 %v1298_v18, %v1293_v20 }
 0x99d   :  { %v1304_v25 = vsel %vm59_vm1, %v1300_v45, 0.0 }
 0x99e   :  { %1305 = vadd.xlane.f32.xlu0 %v1304_v25  ;;  %v1301_v63 = vsel %vm59_vm1, %v1299_v24, 0.0 }
 0x99f   :  { %1302 = vadd.xlane.f32.xlu1 %v1301_v63 }
 0xa2b   :  { %v1306_v1 = vpop.xlane.xlu0 %1305 }
 0xa2c   :  { %v1309_v27 = vmul.f32 0.03125, %v1306_v1  ;;  %v1303_v28 = vpop.xlane.xlu1 %1302 }
 0xa2d   :  { %v1308_v29 = vmul.f32 0.03125, %v1303_v28 }
 0xa2e   :  { %v1311_v46 = vsub.f32 %v1300_v45, %v1309_v27 }
 0xa2f   :  { %v1310_v22 = vsub.f32 %v1299_v24, %v1308_v29 }
 0xa30   :  { %v1313_v26 = vmul.f32 %v1311_v46, %v1311_v46 }
 0xa31   :  { %v1312_v30 = vmul.f32 %v1310_v22, %v1310_v22 }
 0xa32   :  { %v1317_v14 = vsel %vm59_vm1, %v1313_v26, 0.0 }
 0xa33   :  { %v1314_v17 = vsel %vm59_vm1, %v1312_v30, 0.0 }
 0xa34   :  { %1315 = vadd.xlane.f32.xlu0 %v1314_v17 }
 0xa38   :  { %1318 = vadd.xlane.f32.xlu0 %v1317_v14 }
 0xac1   :  { %v1316_v31 = vpop.xlane.xlu0 %1315 }
 0xac2   :  { %v1320_v32 = vmul.f32 0.03125, %v1316_v31 }
 0xac4   :  { %v1322_v37 = vadd.f32 1e-12, %v1320_v32 }
 0xac5   :  { %v1319_v48 = vpop.xlane.xlu0 %1318 }
 0xac6   :  { %1810 = vrsqrt.f32 %v1322_v37  ;;  %v1321_v33 = vmul.f32 0.03125, %v1319_v48 }
 0xac8   :  { %v1323_v52 = vadd.f32 1e-12, %v1321_v33 }
 0xaca   :  { %1812 = vrsqrt.f32 %v1323_v52 }
 0xad0   :  { %v1811_v35 = vpop.eup %1810 }
 0xad1   :  { %v1326_v38 = vmul.f32 %v1811_v35, %v1310_v22 }
 0xad3   :  { %v1332_v39 = vmul.f32 %v1331_v34, %v1326_v38 }
 0xad4   :  { %v1813_v40 = vpop.eup %1812 }
 0xad5   :  { %v1327_v41 = vmul.f32 %v1813_v40, %v1311_v46  ;;  %v1338_v42 = vadd.f32 %v1337_v36, %v1332_v39 }
 0xad7   :  { %v1333_v47 = vmul.f32 %v1331_v34, %v1327_v41  ;;  %1340 = vst.msk [vmem:[#allocation5] sm:$0xff] %vm59_vm1, %v1338_v42 }
 0xad9   :  { %v1339_v49 = vadd.f32 %v1337_v36, %v1333_v47 }
 0xadb   :  { %1341 = vst.msk [vmem:[#allocation5 + $0x8] sm:$0xff] %vm59_vm1, %v1339_v49 }
 0xadc   :  { %1847 = shalt.err (!%p1844_p12)
}
 0xadd   :  { %s1848_s1 = scalar_lea.hbm %s2263_s9, 256 }
 0xade   :  { %p1849_p13 = scmp.ne.s32.totalorder %s2263_s9, %s1848_s1  ;;  %p1852_p0 = scmp.lt.u32.totalorder %s1848_s1, %s2263_s9 }
 0xae0   :  { %p1854_p1 = pnand %p1852_p0, %p1849_p13 }
 0xae2   :  { %1857 = shalt.err (!%p1854_p1)
}
 0xae3   :  { %1353 = dma.vmem_to_hbm [thread:$0]  %s1348_s27, 256, %s2263_s9, [#allocation4], %s1863_s19, %s1863_s19, %s1864_s20  }
 0xae4   :  { %1860 = dma.done.wait [#allocation4], 256  }
 0xae5   :  { %1861 = vsyncadd [#allocation4], 4294967040 }
 0xae6   :  { %1357 = vsyncpa [#allocation3], 1 }
 0xae7   :  { %1358 = vsyncpa [#allocation4], 1 }

</bundles_post_ra>
